<compile_context>
chip_gen: v7x
topology: tpu7x:2x2x1
jax: 0.10.0
libtpu: 0.0.40
codegen_flags: <defaults>
</compile_context>

<pallas_src>
import jax
import jax.numpy as jnp
from jax.experimental import pallas as pl
from jax.experimental.pallas import tpu as pltpu


def _round_up(x, m):
    return ((x + m - 1) // m) * m


def _pick_tile(n_pad, target, prefer_even_quotient=False):
    """Largest multiple of 128 that divides n_pad and is <= target.

    n_pad is always a multiple of 128, so 128 always qualifies.  When
    prefer_even_quotient is set, prefer a tile giving an even tile count so
    the 'parallel' row axis shards evenly across v7x's 2 TensorCores.
    """
    limit = min(target, n_pad)
    candidates = [t for t in range(128, limit + 1, 128) if n_pad % t == 0]
    if not candidates:
        candidates = [128]
    if prefer_even_quotient:
        even = [t for t in candidates if (n_pad // t) % 2 == 0]
        if even:
            return max(even)
    return max(candidates)


def _gcn_kernel(a_ref, x_ref, wt_ref, b_ref, o_ref, acc_ref):
    k = pl.program_id(1)

    @pl.when(k == 0)
    def _():
        acc_ref[...] = jnp.zeros_like(acc_ref)

    # Recompute the XW K-slice on the fly: (tk, f_in) @ (f_in, f_pad) -> f32.
    xw = jnp.dot(x_ref[...], wt_ref[...], preferred_element_type=jnp.float32)

    # Aggregate: (tm, tk) @ (tk, f_pad) on the MXU in the compute dtype,
    # accumulated in the f32 VMEM scratch.
    acc_ref[...] += jnp.dot(a_ref[...], xw.astype(a_ref.dtype),
                            preferred_element_type=jnp.float32)

    @pl.when(k == pl.num_programs(1) - 1)
    def _():
        # bias added in f32, single cast on the lane-dense output store
        o_ref[...] = (acc_ref[...] + b_ref[...]).astype(o_ref.dtype)


def gcn_layer(X, A_hat, W, b, *, tm=512, tk=512, use_bf16=True):
    """Pallas GCN layer. X:[N,F_in], A_hat:[N,N], W:[F_out,F_in], b:[F_out].

    use_bf16=True (default) streams A_hat / X / W^T as bf16 (f32 accumulation,
    f32 bias).  Documented tradeoff: operand rounding of the degree-normalized
    adjacency; set use_bf16=False for a bit-tight f32 path.
    """
    N, f_in = X.shape
    f_out = W.shape[0]
    out_dtype = X.dtype
    cdtype = jnp.bfloat16 if use_bf16 else jnp.float32
    csz = jnp.dtype(cdtype).itemsize
    osz = jnp.dtype(out_dtype).itemsize

    f_pad = _round_up(f_out, 128)          # lane-dense (unmasked) output stores
    n_pad = _round_up(N, 128)              # pad only to the 128-lane grain

    tm = _pick_tile(n_pad, tm, prefer_even_quotient=True)   # row axis ("parallel")
    tk = _pick_tile(n_pad, tk)                               # reduction axis
    assert n_pad % tm == 0 and n_pad % tk == 0

    # Cast to the compute dtype.  Skip the padded host-side copy when N is
    # already a multiple of 128 (astype is a no-op if already in cdtype; for
    # repeated GCN calls the one-time bf16 cast of A_hat amortizes).  Padded
    # rows/cols are zeros, so they contribute exactly zero to the reduction.
    if n_pad == N:
        A_c = A_hat.astype(cdtype)
        X_c = X.astype(cdtype)
    else:
        A_c = jnp.zeros((n_pad, n_pad), cdtype).at[:N, :N].set(A_hat.astype(cdtype))
        X_c = jnp.zeros((n_pad, f_in), cdtype).at[:N, :].set(X.astype(cdtype))
    Wt_c = jnp.zeros((f_in, f_pad), cdtype).at[:, :f_out].set(W.T.astype(cdtype))
    b_c = jnp.zeros((1, f_pad), jnp.float32).at[0, :f_out].set(b.astype(jnp.float32))

    n_row_tiles = n_pad // tm
    n_k_tiles = n_pad // tk

    # Honest VMEM budget: double-buffered streamed operands + resident pieces.
    vmem_bytes = (2 * tm * tk * csz           # A tiles (double-buffered)
                  + 2 * tk * f_in * csz       # X K-slices
                  + 2 * f_in * f_pad * csz    # W^T (resident; conservatively x2)
                  + 2 * f_pad * 4             # bias
                  + 2 * tm * f_pad * osz      # output tiles
                  + tm * f_pad * 4)           # f32 accumulator scratch
    vmem_bytes = int(vmem_bytes * 1.25)                        # ~20% headroom
    vmem_bytes = min(max(vmem_bytes, 4 * 1024 * 1024), 32 * 1024 * 1024)

    out = pl.pallas_call(
        _gcn_kernel,
        out_shape=jax.ShapeDtypeStruct((n_pad, f_pad), out_dtype),
        grid_spec=pltpu.PrefetchScalarGridSpec(
            num_scalar_prefetch=0,
            grid=(n_row_tiles, n_k_tiles),
            in_specs=[
                # A_hat tile: the dominant HBM stream (bf16 by default).
                # TODO(synk): sweep pipeline_mode=pl.Buffered(3) here if an
                # xprof trace still shows exposed A-tile DMA.
                pl.BlockSpec((tm, tk), lambda i, k: (i, k)),
                pl.BlockSpec((tk, f_in), lambda i, k: (k, 0)),     # X K-slice
                pl.BlockSpec((f_in, f_pad), lambda i, k: (0, 0)),  # W^T resident
                pl.BlockSpec((1, f_pad), lambda i, k: (0, 0)),     # bias (f32)
            ],
            out_specs=pl.BlockSpec((tm, f_pad), lambda i, k: (i, 0)),
            scratch_shapes=[pltpu.VMEM((tm, f_pad), jnp.float32)],
        ),
        compiler_params=pltpu.CompilerParams(
            dimension_semantics=("parallel", "arbitrary"),
            vmem_limit_bytes=vmem_bytes,
        ),
        cost_estimate=pl.CostEstimate(
            flops=(2 * n_pad * n_pad * f_pad                    # A @ XW
                   + 2 * n_row_tiles * n_pad * f_in * f_pad),   # recomputed XW
            transcendentals=0,
            bytes_accessed=(n_pad * n_pad * csz                  # A (read once)
                            + n_row_tiles * n_pad * f_in * csz   # X re-reads
                            + f_in * f_pad * csz + f_pad * 4     # W^T + bias
                            + n_pad * f_pad * osz),              # output
        ),
    )(A_c, X_c, Wt_c, b_c)

    return out[:N, :f_out]


if __name__ == "__main__":
    N, F_IN, F_OUT = 128, 64, 32

    key = jax.random.PRNGKey(0)
    k_x, k_a, k_w, k_b = jax.random.split(key, 4)

    # node features
    X = jax.random.normal(k_x, (N, F_IN), dtype=jnp.float32)

    # symmetric normalized adjacency with self-loops (deterministic)
    adj = (jax.random.uniform(k_a, (N, N)) < 0.1).astype(jnp.float32)
    adj = jnp.maximum(adj, adj.T)
    adj = adj + jnp.eye(N, dtype=jnp.float32)
    deg = jnp.sum(adj, axis=1)
    d_inv_sqrt = 1.0 / jnp.sqrt(deg)
    A_hat = adj * d_inv_sqrt[:, None] * d_inv_sqrt[None, :]

    # nn.Linear(F_IN, F_OUT) parameters (PyTorch-style uniform init)
    bound = 1.0 / jnp.sqrt(jnp.float32(F_IN))
    W = jax.random.uniform(k_w, (F_OUT, F_IN), minval=-bound, maxval=bound,
                           dtype=jnp.float32)
    b = jax.random.uniform(k_b, (F_OUT,), minval=-bound, maxval=bound,
                           dtype=jnp.float32)

    # pure-JAX reference of the PyTorch forward: linear(A_hat @ X)
    hp = jax.lax.Precision.HIGHEST
    ref = jnp.matmul(jnp.matmul(A_hat, X, precision=hp), W.T, precision=hp) + b

    # default bf16 MXU path (f32 accumulation): looser tolerance
    out_bf16 = jax.block_until_ready(gcn_layer(X, A_hat, W, b))
    assert out_bf16.shape == (N, F_OUT)
    assert jnp.allclose(out_bf16, ref, atol=5e-2, rtol=5e-2), "bf16 mismatch vs reference"

    # f32 fallback path: matches the reference tightly
    out_f32 = jax.block_until_ready(gcn_layer(X, A_hat, W, b, use_bf16=False))
    assert out_f32.shape == (N, F_OUT)
    assert jnp.allclose(out_f32, ref, atol=1e-4, rtol=1e-4), "f32 mismatch vs reference"

    print("KERNEL_OK")
</pallas_src>

<mosaic_0001>
module attributes {stable_mosaic.version = 11 : i64} {
  func.func @_gcn_kernel(%arg0: i32, %arg1: i32, %arg2: memref<128x128xbf16, #tpu.memory_space<vmem>>, %arg3: memref<128x64xbf16, #tpu.memory_space<vmem>>, %arg4: memref<64x128xbf16, #tpu.memory_space<vmem>>, %arg5: memref<1x128xf32, #tpu.memory_space<vmem>>, %arg6: memref<128x128xf32, #tpu.memory_space<vmem>>, %arg7: memref<128x128xf32, #tpu.memory_space<vmem>>) attributes {dimension_semantics = [#tpu.dimension_semantics<parallel>, #tpu.dimension_semantics<arbitrary>], iteration_bounds = array<i64: 1, 1>, scalar_prefetch = 0 : i64, scratch_operands = 1 : i64, tpu.core_type = #tpu.core_type<tc>, window_params = [{transform_indices = @transform_0, window_bounds = array<i64: 128, 128>}, {transform_indices = @transform_1, window_bounds = array<i64: 128, 64>}, {pipeline_mode = #tpu.pipeline_mode<synchronous>, transform_indices = @transform_2, window_bounds = array<i64: 64, 128>}, {pipeline_mode = #tpu.pipeline_mode<synchronous>, transform_indices = @transform_3, window_bounds = array<i64: 1, 128>}, {transform_indices = @transform_4, window_bounds = array<i64: 128, 128>}]} {
    %c0_i32 = arith.constant 0 : i32
    %0 = arith.cmpi eq, %arg1, %c0_i32 : i32
    %1 = arith.extui %0 : i1 to i32
    %c0_i32_0 = arith.constant 0 : i32
    %2 = arith.cmpi ne, %1, %c0_i32_0 : i32
    scf.if %2 {
      %cst_13 = arith.constant 0.000000e+00 : f32
      %15 = vector.broadcast %cst_13 : f32 to vector<128x128xf32>
      %c0_14 = arith.constant 0 : index
      %c0_15 = arith.constant 0 : index
      %16 = vector.load %arg7[%c0_14, %c0_15] : memref<128x128xf32, #tpu.memory_space<vmem>>, vector<128x128xf32>
      tpu.vector_store %arg7[%c0_14, %c0_15], %15 {strides = array<i32>} : memref<128x128xf32, #tpu.memory_space<vmem>>, vector<128x128xf32>,
    } else {
    }
    %c0 = arith.constant 0 : index
    %c0_1 = arith.constant 0 : index
    %3 = vector.load %arg3[%c0, %c0_1] : memref<128x64xbf16, #tpu.memory_space<vmem>>, vector<128x64xbf16>
    %c0_2 = arith.constant 0 : index
    %c0_3 = arith.constant 0 : index
    %4 = vector.load %arg4[%c0_2, %c0_3] : memref<64x128xbf16, #tpu.memory_space<vmem>>, vector<64x128xbf16>
    %cst = arith.constant dense<0.000000e+00> : vector<128x128xf32>
    %5 = tpu.matmul %3, %4, %cst {dimension_numbers = #tpu.dot_dimension_numbers<[1], [0], [0], [1], [0, 0, 1, 1], [], []>} : vector<128x64xbf16>, vector<64x128xbf16>, vector<128x128xf32> -> vector<128x128xf32>
    %c0_4 = arith.constant 0 : index
    %c0_5 = arith.constant 0 : index
    %6 = vector.load %arg7[%c0_4, %c0_5] : memref<128x128xf32, #tpu.memory_space<vmem>>, vector<128x128xf32>
    %c0_6 = arith.constant 0 : index
    %c0_7 = arith.constant 0 : index
    %7 = vector.load %arg2[%c0_6, %c0_7] : memref<128x128xbf16, #tpu.memory_space<vmem>>, vector<128x128xbf16>
    %8 = arith.truncf %5 : vector<128x128xf32> to vector<128x128xbf16>
    %cst_8 = arith.constant dense<0.000000e+00> : vector<128x128xf32>
    %9 = tpu.matmul %7, %8, %cst_8 {dimension_numbers = #tpu.dot_dimension_numbers<[1], [0], [0], [1], [0, 0, 1, 1], [], []>} : vector<128x128xbf16>, vector<128x128xbf16>, vector<128x128xf32> -> vector<128x128xf32>
    %10 = arith.addf %6, %9 : vector<128x128xf32>
    %c0_9 = arith.constant 0 : index
    %c0_10 = arith.constant 0 : index
    %11 = vector.load %arg7[%c0_9, %c0_10] : memref<128x128xf32, #tpu.memory_space<vmem>>, vector<128x128xf32>
    tpu.vector_store %arg7[%c0_9, %c0_10], %10 {strides = array<i32>} : memref<128x128xf32, #tpu.memory_space<vmem>>, vector<128x128xf32>,
    %c0_i32_11 = arith.constant 0 : i32
    %12 = arith.cmpi eq, %arg1, %c0_i32_11 : i32
    %13 = arith.extui %12 : i1 to i32
    %c0_i32_12 = arith.constant 0 : i32
    %14 = arith.cmpi ne, %13, %c0_i32_12 : i32
    scf.if %14 {
      %c0_13 = arith.constant 0 : index
      %c0_14 = arith.constant 0 : index
      %15 = vector.load %arg7[%c0_13, %c0_14] : memref<128x128xf32, #tpu.memory_space<vmem>>, vector<128x128xf32>
      %c0_15 = arith.constant 0 : index
      %c0_16 = arith.constant 0 : index
      %16 = vector.load %arg5[%c0_15, %c0_16] : memref<1x128xf32, #tpu.memory_space<vmem>>, vector<1x128xf32>
      %17 = vector.broadcast %16 : vector<1x128xf32> to vector<128x128xf32>
      %18 = arith.addf %15, %17 : vector<128x128xf32>
      %c0_17 = arith.constant 0 : index
      %c0_18 = arith.constant 0 : index
      %19 = vector.load %arg6[%c0_17, %c0_18] : memref<128x128xf32, #tpu.memory_space<vmem>>, vector<128x128xf32>
      tpu.vector_store %arg6[%c0_17, %c0_18], %18 {strides = array<i32>} : memref<128x128xf32, #tpu.memory_space<vmem>>, vector<128x128xf32>,
    } else {
    }
    return
  }
  func.func @transform_0(%arg0: i32, %arg1: i32) -> (i32, i32) {
    %c0_i32 = arith.constant 0 : i32
    return %arg0, %arg1 : i32, i32
  }
  func.func @transform_1(%arg0: i32, %arg1: i32) -> (i32, i32) {
    %c0_i32 = arith.constant 0 : i32
    %c0_i32_0 = arith.constant 0 : i32
    return %arg1, %c0_i32 : i32, i32
  }
  func.func @transform_2(%arg0: i32, %arg1: i32) -> (i32, i32) {
    %c0_i32 = arith.constant 0 : i32
    %c0_i32_0 = arith.constant 0 : i32
    %c0_i32_1 = arith.constant 0 : i32
    return %c0_i32, %c0_i32_0 : i32, i32
  }
  func.func @transform_3(%arg0: i32, %arg1: i32) -> (i32, i32) {
    %c0_i32 = arith.constant 0 : i32
    %c0_i32_0 = arith.constant 0 : i32
    %c0_i32_1 = arith.constant 0 : i32
    return %c0_i32, %c0_i32_0 : i32, i32
  }
  func.func @transform_4(%arg0: i32, %arg1: i32) -> (i32, i32) {
    %c0_i32 = arith.constant 0 : i32
    %c0_i32_0 = arith.constant 0 : i32
    return %arg0, %c0_i32 : i32, i32
  }
}

</mosaic_0001>

<bundles_post_ra>
// kernel: tpu_custom_call.1
= control target key start
LH: loop header
LB: loop body
LE: loop exit
PB: predicated region body
PF: predicated region fallthrough
CT: control target
= control target key end

     0   :  { %vm127_vm0 = vcmask 523264   ;;  %s827_s0 = inlined_call_operand.vmem [shape: bf16[128,128], index: 0, kind: input, shape index: {}]   ;;  %s828_s1 = inlined_call_operand.vmem [shape: bf16[128,64], index: 1, kind: input, shape index: {}]   ;;  %s829_s2 = inlined_call_operand.vmem [shape: bf16[64,128], index: 2, kind: input, shape index: {}]   ;;  %s830_s3 = inlined_call_operand.vmem [shape: f32[1,128], index: 3, kind: input, shape index: {}]   ;;  %s831_s4 = inlined_call_operand.hbm [shape: f32[128,128], index: 4, kind: output, shape index: {}]  }
   0x1   :  { %v672_v0 = vld [vmem:[%s829_s2] sm:$0xff]   ;;  %v673_v1 = vld [vmem:[%s829_s2 + $0x8] sm:$0xff]   ;;  %v674_v2 = vld [vmem:[%s829_s2 + $0x10] sm:$0xff]  }
   0x2   :  { %597 = vmatprep.subr.bf16.mxu0 %v672_v0  ;;  %v676_v3 = vld [vmem:[%s828_s1] sm:$0xff]   ;;  %v675_v4 = vld [vmem:[%s829_s2 + $0x18] sm:$0xff]   ;;  %v677_v5 = vld [vmem:[%s828_s1 + $0x8] sm:$0xff]  }
   0x3   :  { %598 = vmatpush3.bf16.msra.mxu0 %v672_v0  ;;  %605 = vmatprep.mubr.msk.bf16.mxu0 %vm127_vm0, %v676_v3  ;;  %v678_v6 = vld [vmem:[%s828_s1 + $0x10] sm:$0xff]  }
   0x4   :  { %599 = vmatprep.subr.bf16.mxu0 %v673_v1 }
   0x7   :  { %600 = vmatpush3.bf16.msra.mxu0 %v673_v1 }
   0x8   :  { %601 = vmatprep.subr.bf16.mxu0 %v674_v2 }
   0xb   :  { %602 = vmatpush3.bf16.msra.mxu0 %v674_v2 }
   0xc   :  { %603 = vmatprep.subr.bf16.mxu0 %v675_v4 }
   0xf   :  { %604 = vmatpush3.bf16.msra.mxu0 %v675_v4 }
  0x10   :  { %9 = vsyncpa [#allocation4], 0  ;;  %v679_v7 = vld [vmem:[%s828_s1 + $0x18] sm:$0xff]   ;;  %v680_v8 = vld [vmem:[%s828_s1 + $0x20] sm:$0xff]  }
  0x11   :  { %v681_v9 = vld [vmem:[%s828_s1 + $0x28] sm:$0xff]   ;;  %v682_v10 = vld [vmem:[%s828_s1 + $0x30] sm:$0xff]   ;;  %v683_v11 = vld [vmem:[%s828_s1 + $0x38] sm:$0xff]  }
  0x12   :  { %606 = vmatmul.mubr.msk.bf16.vlgmr.msra.gmra.mrb[0].mxu0 %vm127_vm0, %v677_v5  ;;  %v684_v12 = vld [vmem:[%s827_s0 + $0x10] sm:$0xff]   ;;  %v688_v13 = vld [vmem:[%s827_s0] sm:$0xff]   ;;  %v685_v38 = vld [vmem:[%s827_s0 + $0x18] sm:$0xff]  }
  0x13   :  { %609 = vmatprep.mubr.msk.bf16.mxu0 %vm127_vm0, %v678_v6  ;;  %641 = vmatprep.mubr.bf16.mxu1 %v684_v12  ;;  %v689_v39 = vld [vmem:[%s827_s0 + $0x8] sm:$0xff]   ;;  %v686_v40 = vld [vmem:[%s827_s0 + $0x20] sm:$0xff]   ;;  %v690_v42 = vld [vmem:[%s827_s0 + $0x30] sm:$0xff]  }
  0x14   :  { %v687_v41 = vld [vmem:[%s827_s0 + $0x28] sm:$0xff]   ;;  %v691_v43 = vld [vmem:[%s827_s0 + $0x38] sm:$0xff]   ;;  %v568_v44 = vld [vmem:[%s830_s3] ss:$0 sm:$0xff]  ;;  %s716_s0 = smov [#allocation3]  }
  0x15   :  { %s529_s3 = sshll.u32 %s716_s0, 4  ;;  %s530_s3 = int_to_ptr.vmem [resolvable:$true] %s529_s3 }
  0x16   :  { %s692_s29 = scalar_lea.vmem %s530_s3, 2048  ;;  %p697_p1 = scmp.lt.s32.totalorder %s530_s3, %s530_s3 }
  0x17   :  { %p693_p0 = scmp.ne.s32.totalorder %s530_s3, %s692_s29  ;;  %p698_p2 = scmp.lt.s32.totalorder %s692_s29, %s692_s29 }
  0x19   :  { %p699_p3 = por %p698_p2, %p697_p1 }
  0x1a   :  { %610 = vmatmul.mubr.msk.bf16.gmra.mrb[4].mxu0 %vm127_vm0, %v679_v7 }
  0x1b   :  { %613 = vmatprep.mubr.msk.bf16.mxu0 %vm127_vm0, %v680_v8  ;;  %p700_p4 = pnand %p699_p3, %p693_p0 }
  0x22   :  { %614 = vmatmul.mubr.msk.bf16.gmra.mrb[8].mxu0 %vm127_vm0, %v681_v9 }
  0x23   :  { %617 = vmatprep.mubr.msk.bf16.mxu0 %vm127_vm0, %v682_v10 }
  0x2a   :  { %618 = vmatmul.mubr.msk.bf16.gmra.mrb[12].mxu0 %vm127_vm0, %v683_v11 }
  0x2b   :  { %637 = vmatprep.mubr.bf16.mxu0 %v688_v13 }
  0xe5   :  { %v607_v14 = vpop.f32.mrb[0].mxu0 }
  0xe6   :  { %v186_v15 = vpop.f32.mrb[1].mxu0 }
  0xe7   :  { %v608_v16 = vpop.f32.mrb[2].mxu0 }
  0xe8   :  { %v282_v17 = vpack.c.bf16 %v608_v16, %v607_v14  ;;  %v189_v18 = vpop.f32.mrb[3].mxu0 }
  0xe9   :  { %v281_v19 = vpack.c.bf16 %v189_v18, %v186_v15 }
  0xeb   :  { %621 = vmatprep.subr.bf16.mxu0 %v281_v19  ;;  %653 = vmatprep.subr.bf16.mxu1 %v281_v19 }
  0xec   :  { %622 = vmatpush3.bf16.msra.mxu0 %v281_v19  ;;  %661 = vmatpush3.bf16.msra.mxu1 %v281_v19 }
  0xed   :  { %v611_v20 = vpop.f32.mrb[4].mxu0  ;;  %623 = vmatprep.subr.bf16.mxu0 %v282_v17  ;;  %654 = vmatprep.subr.bf16.mxu1 %v282_v17 }
  0xee   :  { %v202_v21 = vpop.f32.mrb[5].mxu0 }
  0xef   :  { %v612_v22 = vpop.f32.mrb[6].mxu0 }
  0xf0   :  { %v284_v23 = vpack.c.bf16 %v612_v22, %v611_v20  ;;  %v205_v24 = vpop.f32.mrb[7].mxu0  ;;  %624 = vmatpush3.bf16.msra.mxu0 %v282_v17  ;;  %662 = vmatpush3.bf16.msra.mxu1 %v282_v17 }
  0xf1   :  { %v283_v25 = vpack.c.bf16 %v205_v24, %v202_v21 }
  0xf3   :  { %625 = vmatprep.subr.bf16.mxu0 %v283_v25  ;;  %655 = vmatprep.subr.bf16.mxu1 %v283_v25 }
  0xf4   :  { %626 = vmatpush3.bf16.msra.mxu0 %v283_v25  ;;  %663 = vmatpush3.bf16.msra.mxu1 %v283_v25 }
  0xf5   :  { %v615_v26 = vpop.f32.mrb[8].mxu0  ;;  %627 = vmatprep.subr.bf16.mxu0 %v284_v23  ;;  %656 = vmatprep.subr.bf16.mxu1 %v284_v23 }
  0xf6   :  { %v218_v27 = vpop.f32.mrb[9].mxu0 }
  0xf7   :  { %v616_v28 = vpop.f32.mrb[10].mxu0 }
  0xf8   :  { %v286_v29 = vpack.c.bf16 %v616_v28, %v615_v26  ;;  %v221_v30 = vpop.f32.mrb[11].mxu0  ;;  %628 = vmatpush3.bf16.msra.mxu0 %v284_v23  ;;  %664 = vmatpush3.bf16.msra.mxu1 %v284_v23 }
  0xf9   :  { %v285_v31 = vpack.c.bf16 %v221_v30, %v218_v27 }
  0xfb   :  { %629 = vmatprep.subr.bf16.mxu0 %v285_v31  ;;  %657 = vmatprep.subr.bf16.mxu1 %v285_v31 }
  0xfc   :  { %630 = vmatpush3.bf16.msra.mxu0 %v285_v31  ;;  %665 = vmatpush3.bf16.msra.mxu1 %v285_v31 }
  0xfd   :  { %v619_v32 = vpop.f32.mrb[12].mxu0  ;;  %631 = vmatprep.subr.bf16.mxu0 %v286_v29  ;;  %658 = vmatprep.subr.bf16.mxu1 %v286_v29 }
  0xfe   :  { %v234_v33 = vpop.f32.mrb[13].mxu0 }
  0xff   :  { %v620_v34 = vpop.f32.mrb[14].mxu0 }
 0x100   :  { %v288_v35 = vpack.c.bf16 %v620_v34, %v619_v32  ;;  %v237_v36 = vpop.f32.mrb[15].mxu0  ;;  %632 = vmatpush3.bf16.msra.mxu0 %v286_v29  ;;  %666 = vmatpush3.bf16.msra.mxu1 %v286_v29 }
 0x101   :  { %v287_v37 = vpack.c.bf16 %v237_v36, %v234_v33 }
 0x103   :  { %633 = vmatprep.subr.bf16.mxu0 %v287_v37  ;;  %659 = vmatprep.subr.bf16.mxu1 %v287_v37 }
 0x104   :  { %634 = vmatpush3.bf16.msra.mxu0 %v287_v37  ;;  %667 = vmatpush3.bf16.msra.mxu1 %v287_v37 }
 0x105   :  { %635 = vmatprep.subr.bf16.mxu0 %v288_v35  ;;  %660 = vmatprep.subr.bf16.mxu1 %v288_v35 }
 0x108   :  { %636 = vmatpush3.bf16.msra.mxu0 %v288_v35  ;;  %668 = vmatpush3.bf16.msra.mxu1 %v288_v35 }
 0x10b   :  { %642 = vmatmul.mubr.bf16.vlgmr.msra.gmra.mrb[0].mxu1 %v685_v38  ;;  %638 = vmatmul.mubr.bf16.vlgmr.msra.gmra.mrb[16].mxu0 %v689_v39 }
 0x10c   :  { %645 = vmatprep.mubr.bf16.mxu1 %v686_v40 }
 0x113   :  { %646 = vmatmul.mubr.bf16.gmra.mrb[4].mxu1 %v687_v41 }
 0x114   :  { %649 = vmatprep.mubr.bf16.mxu1 %v690_v42 }
 0x11b   :  { %650 = vmatmul.mubr.bf16.gmra.mrb[8].mxu1 %v691_v43 }
 0x1de   :  { %v643_v45 = vpop.f32.mrb[0].mxu1  ;;  %v639_v46 = vpop.f32.mrb[16].mxu0 }
 0x1df   :  { %v498_v47 = vadd.f32 %v643_v45, %v568_v44  ;;  %v387_v48 = vpop.f32.mrb[1].mxu1  ;;  %v494_v49 = vadd.f32 %v639_v46, %v568_v44  ;;  %v371_v50 = vpop.f32.mrb[17].mxu0 }
 0x1e0   :  { %v496_v51 = vadd.f32 %v568_v44, %v387_v48  ;;  %v644_v52 = vpop.f32.mrb[2].mxu1  ;;  %v492_v53 = vadd.f32 %v568_v44, %v371_v50  ;;  %v640_v54 = vpop.f32.mrb[18].mxu0 }
 0x1e1   :  { %514 = vst [vmem:[#allocation3 + $0x30] sm:$0xff] %v498_v47  ;;  %v499_v55 = vadd.f32 %v644_v52, %v568_v44  ;;  %v390_v56 = vpop.f32.mrb[3].mxu1  ;;  %510 = vst [vmem:[#allocation3 + $0x10] sm:$0xff] %v494_v49  ;;  %v495_v57 = vadd.f32 %v640_v54, %v568_v44  ;;  %v374_v58 = vpop.f32.mrb[19].mxu0 }
 0x1e2   :  { %512 = vst [vmem:[#allocation3 + $0x20] sm:$0xff] %v496_v51  ;;  %v497_v59 = vadd.f32 %v568_v44, %v390_v56  ;;  %508 = vst [vmem:[#allocation3] sm:$0xff] %v492_v53  ;;  %v493_v60 = vadd.f32 %v568_v44, %v374_v58 }
 0x1e3   :  { %515 = vst [vmem:[#allocation3 + $0x38] sm:$0xff] %v499_v55  ;;  %511 = vst [vmem:[#allocation3 + $0x18] sm:$0xff] %v495_v57 }
 0x1e4   :  { %513 = vst [vmem:[#allocation3 + $0x28] sm:$0xff] %v497_v59  ;;  %509 = vst [vmem:[#allocation3 + $0x8] sm:$0xff] %v493_v60 }
 0x1e6   :  { %v647_v61 = vpop.f32.mrb[4].mxu1 }
 0x1e7   :  { %v502_v62 = vadd.f32 %v647_v61, %v568_v44  ;;  %v403_v63 = vpop.f32.mrb[5].mxu1 }
 0x1e8   :  { %v500_v0 = vadd.f32 %v568_v44, %v403_v63  ;;  %v648_v1 = vpop.f32.mrb[6].mxu1 }
 0x1e9   :  { %518 = vst [vmem:[#allocation3 + $0x50] sm:$0xff] %v502_v62  ;;  %v503_v2 = vadd.f32 %v648_v1, %v568_v44  ;;  %v406_v3 = vpop.f32.mrb[7].mxu1 }
 0x1ea   :  { %516 = vst [vmem:[#allocation3 + $0x40] sm:$0xff] %v500_v0  ;;  %v501_v4 = vadd.f32 %v568_v44, %v406_v3 }
 0x1eb   :  { %519 = vst [vmem:[#allocation3 + $0x58] sm:$0xff] %v503_v2 }
 0x1ec   :  { %517 = vst [vmem:[#allocation3 + $0x48] sm:$0xff] %v501_v4 }
 0x1ee   :  { %v651_v5 = vpop.f32.mrb[8].mxu1 }
 0x1ef   :  { %v506_v6 = vadd.f32 %v651_v5, %v568_v44  ;;  %v419_v7 = vpop.f32.mrb[9].mxu1 }
 0x1f0   :  { %v504_v8 = vadd.f32 %v568_v44, %v419_v7  ;;  %v652_v9 = vpop.f32.mrb[10].mxu1 }
 0x1f1   :  { %522 = vst [vmem:[#allocation3 + $0x70] sm:$0xff] %v506_v6  ;;  %v507_v10 = vadd.f32 %v652_v9, %v568_v44  ;;  %v422_v11 = vpop.f32.mrb[11].mxu1 }
 0x1f2   :  { %520 = vst [vmem:[#allocation3 + $0x60] sm:$0xff] %v504_v8  ;;  %v505_v12 = vadd.f32 %v568_v44, %v422_v11 }
 0x1f3   :  { %523 = vst [vmem:[#allocation3 + $0x78] sm:$0xff] %v507_v10 }
 0x1f4   :  { %521 = vst [vmem:[#allocation3 + $0x68] sm:$0xff] %v505_v12 }
 0x1f5   :  { %703 = shalt.err (!%p700_p4)
}
 0x1f6   :  { %s704_s5 = scalar_lea.hbm %s831_s4, 2048 }
 0x1f7   :  { %p705_p5 = scmp.ne.s32.totalorder %s831_s4, %s704_s5  ;;  %p708_p6 = scmp.lt.u32.totalorder %s704_s5, %s831_s4 }
 0x1f9   :  { %p710_p7 = pnand %p708_p6, %p705_p5 }
 0x1fb   :  { %713 = shalt.err (!%p710_p7)
}
 0x1fc   :  { %s717_s10 = smov 128   ;;  %s718_s11 = smov 8  }
 0x1fd   :  { %535 = dma.vmem_to_hbm [thread:$0]  %s530_s3, 2048, %s831_s4, [#allocation4], %s717_s10, %s717_s10, %s718_s11  }
 0x1fe   :  { %714 = dma.done.wait [#allocation4], 2048  }
 0x1ff   :  { %715 = vsyncadd [#allocation4], 4294965248 }
 0x200   :  { %539 = vsyncpa [#allocation4], 1 }

</bundles_post_ra>
